<compile_context>
chip_gen: v6e
topology: v6e:2x2x1
jax: 0.10.0
libtpu: 0.0.40
codegen_flags: <defaults>
</compile_context>

<pallas_src>
import functools

import jax
import jax.numpy as jnp
from jax import lax
from jax.experimental import pallas as pl
from jax.experimental.pallas import tpu as pltpu


def _round_up(x, m):
    return ((x + m - 1) // m) * m


def _pick_m_tile(n_patches, cap=512):
    """Pick (tm, n_patches_pad): MXU-friendly tile height + per-batch padding.

    Prefers tm as a multiple of 256 (v6e/v7x MXU pass), then 128 (v5e MXU),
    then 8 (sublane), accepting an alignment level only while the implied
    zero-padding stays <= ~33% of the real rows.  cap=512 keeps the
    resident-weight + full-N-tile VMEM footprint within v7x's 64 MiB.
    """
    for align in (256, 128, 8):
        tm = min(cap, _round_up(n_patches, align))
        tm -= tm % align
        if tm == 0:
            continue
        npad = _round_up(n_patches, tm)
        if align == 8 or 3 * (npad - n_patches) <= n_patches:
            return tm, npad
    raise AssertionError("unreachable")


def _patch_embed_kernel(p_ref, w_ref, pb_ref, o_ref):
    # Collapsed K grid: one MXU pass per (M, N) tile, bias+pos fused epilogue,
    # no accumulator scratch (per perf review).
    o_ref[...] = (
        lax.dot_general(
            p_ref[...], w_ref[...],
            dimension_numbers=(((1,), (0,)), ((), ())),
            preferred_element_type=jnp.float32,
        )
        + pb_ref[...]
    ).astype(o_ref.dtype)


def _patch_embed_kernel_acc(p_ref, w_ref, pb_ref, o_ref, acc_ref):
    # General K-tiled fallback (patch_dim_pad too large for one VMEM K slab).
    k = pl.program_id(2)
    part = lax.dot_general(
        p_ref[...], w_ref[...],
        dimension_numbers=(((1,), (0,)), ((), ())),
        preferred_element_type=jnp.float32,
    )

    @pl.when(k == 0)
    def _():
        acc_ref[...] = part          # direct write, no zero-init + '+='

    @pl.when(k > 0)
    def _():
        acc_ref[...] += part

    @pl.when(k == pl.num_programs(2) - 1)
    def _():
        o_ref[...] = (acc_ref[...] + pb_ref[...]).astype(o_ref.dtype)


@functools.partial(jax.jit, static_argnames=("patch_size",))
def patch_embedding_block(x, conv_weight, conv_bias, pos_embeddings, patch_size):
    """Forward pass of PatchEmbeddingBlock with pos_embed='conv'.

    x:              (B, C, D, H, W)
    conv_weight:    (hidden, C, pd, ph, pw)
    conv_bias:      (hidden,)
    pos_embeddings: (1, n_patches, hidden)
    returns         (B, n_patches, hidden)
    """
    B, C, D, H, W = x.shape
    pd, ph, pw = patch_size
    hidden = conv_weight.shape[0]
    gd, gh, gw = D // pd, H // ph, W // pw
    n_patches = gd * gh * gw
    patch_dim = C * pd * ph * pw
    out_dtype = x.dtype
    out_isz = jnp.dtype(out_dtype).itemsize

    # ---- padded problem sizes (lane = 128, sublane = 8) -------------------
    n_pad = _round_up(hidden, 128)         # GEMM N (lane-dense output stores)
    k_pad = _round_up(patch_dim, 128)      # GEMM K (zero-pad is exact)
    tm, np_pad = _pick_m_tile(n_patches, cap=512)
    npos_blocks = np_pad // tm
    m_total = B * np_pad

    # ---- tile sizes: collapse the N / K grids for typical ViT shapes ------
    if n_pad <= 1024:
        tn = n_pad                          # N grid = 1 -> patches stream once
    else:
        tn = 512
        n_pad = _round_up(n_pad, tn)
    if k_pad <= 4096:
        tk = k_pad                          # K grid = 1 -> weight resident, no acc
    else:
        tk = 2048
        k_pad = _round_up(k_pad, tk)
    m_blocks, n_blocks, k_blocks = m_total // tm, n_pad // tn, k_pad // tk

    # ---- operand preparation (bf16 MXU path, f32 epilogue) ----------------
    xb = x.astype(jnp.bfloat16)
    # im2col, materialized by XLA so the kernel's input DMAs are contiguous
    # tiles (per-patch element order (c, kd, kh, kw) matches the Conv3d weight).
    patches = (
        xb.reshape(B, C, gd, pd, gh, ph, gw, pw)
        .transpose(0, 2, 4, 6, 1, 3, 5, 7)
        .reshape(B, n_patches, patch_dim)
    )
    if np_pad != n_patches or k_pad != patch_dim:
        patches = jnp.pad(
            patches, ((0, 0), (0, np_pad - n_patches), (0, k_pad - patch_dim)))
    patches = patches.reshape(m_total, k_pad)

    # Weight transposed once (HBM, few MiB) to (K, N): kernel contracts
    # (1,)x(0,) with no per-tile XLU transpose; with collapsed N/K grids its
    # block index is constant so it is DMA'd into VMEM exactly once.
    w2 = conv_weight.reshape(hidden, patch_dim).astype(jnp.bfloat16).T
    if k_pad != patch_dim or n_pad != hidden:
        w2 = jnp.pad(w2, ((0, k_pad - patch_dim), (0, n_pad - hidden)))

    # conv bias folded into the position embeddings (single f32 epilogue add).
    posb = (pos_embeddings.reshape(n_patches, hidden).astype(jnp.float32)
            + conv_bias.astype(jnp.float32)[None, :])
    if np_pad != n_patches or n_pad != hidden:
        posb = jnp.pad(posb, ((0, np_pad - n_patches), (0, n_pad - hidden)))

    # ---- VMEM budget (<= 48 MiB so the same config also fits v7x) ---------
    vmem_est = 2 * (tm * tk * 2 + tk * tn * 2 + tm * tn * 4 + tm * tn * out_isz)
    if k_blocks > 1:
        vmem_est += tm * tn * 4
    vmem_limit = min(48 * 1024 * 1024,
                     max(32 * 1024 * 1024, int(vmem_est * 5 // 4)))

    cost = pl.CostEstimate(
        flops=2 * m_total * k_pad * n_pad,
        transcendentals=0,
        bytes_accessed=(
            patches.size * 2
            + w2.size * 2 * (1 if n_blocks * k_blocks == 1 else m_blocks)
            + posb.size * 4 * B
            + m_total * n_pad * out_isz),
    )

    kernel = _patch_embed_kernel if k_blocks == 1 else _patch_embed_kernel_acc
    scratch = [] if k_blocks == 1 else [pltpu.VMEM((tm, tn), jnp.float32)]

    out = pl.pallas_call(
        kernel,
        out_shape=jax.ShapeDtypeStruct((m_total, n_pad), out_dtype),
        grid_spec=pltpu.PrefetchScalarGridSpec(
            num_scalar_prefetch=0,
            grid=(m_blocks, n_blocks, k_blocks),
            in_specs=[
                pl.BlockSpec((tm, tk), lambda i, n, k: (i, k)),
                pl.BlockSpec((tk, tn), lambda i, n, k: (k, n)),
                pl.BlockSpec((tm, tn), lambda i, n, k: (i % npos_blocks, n)),
            ],
            out_specs=pl.BlockSpec((tm, tn), lambda i, n, k: (i, n)),
            scratch_shapes=scratch,
        ),
        compiler_params=pltpu.CompilerParams(
            dimension_semantics=("parallel", "parallel", "arbitrary"),
            vmem_limit_bytes=vmem_limit,
        ),
        cost_estimate=cost,
    )(patches, w2, posb)

    out = out.reshape(B, np_pad, n_pad)[:, :n_patches, :hidden]
    # dropout_rate = 0.0 -> identity (inference semantics).
    return out


if __name__ == "__main__":
    # Small, consistent shapes: in_channels=4, img_size=(16,16,16),
    # patch_size=(4,4,4), hidden_size=32, num_heads=4 (hidden % heads == 0).
    B, C = 2, 4
    img_size = (16, 16, 16)
    patch_size = (4, 4, 4)
    hidden = 32

    gd, gh, gw = (i // p for i, p in zip(img_size, patch_size))
    n_patches = gd * gh * gw
    patch_dim = C * patch_size[0] * patch_size[1] * patch_size[2]

    key = jax.random.PRNGKey(0)
    kx, kw, kb, kp = jax.random.split(key, 4)

    x = jax.random.normal(kx, (B, C) + img_size, dtype=jnp.float32)

    # Deterministic synthetic init (shapes match nn.Conv3d / nn.Parameter).
    fan_in = patch_dim
    bound = 1.0 / jnp.sqrt(fan_in)
    conv_weight = jax.random.uniform(
        kw, (hidden, C) + patch_size, minval=-bound, maxval=bound,
        dtype=jnp.float32)
    conv_bias = jax.random.uniform(
        kb, (hidden,), minval=-bound, maxval=bound, dtype=jnp.float32)
    # trunc_normal_(mean=0, std=0.02, a=-2, b=2): normal(0, 0.02) clipped.
    pos_embeddings = jnp.clip(
        0.02 * jax.random.normal(kp, (1, n_patches, hidden), dtype=jnp.float32),
        -2.0, 2.0)

    out = patch_embedding_block(x, conv_weight, conv_bias, pos_embeddings,
                                patch_size)
    out = jax.block_until_ready(out)

    # Pure-JAX reference (Conv3d stride=kernel + flatten(2).transpose + pos add)
    # computed on the same bf16-quantized inputs the kernel's MXU path sees,
    # with f32 accumulation -> only reduction-order differences remain.
    xq = x.astype(jnp.bfloat16).astype(jnp.float32)
    wq = conv_weight.astype(jnp.bfloat16).astype(jnp.float32)
    ref_conv = lax.conv_general_dilated(
        xq, wq, window_strides=patch_size, padding="VALID",
        dimension_numbers=("NCDHW", "OIDHW", "NCDHW"))
    ref_conv = ref_conv + conv_bias[None, :, None, None, None]
    ref = ref_conv.reshape(B, hidden, n_patches).transpose(0, 2, 1) + pos_embeddings

    assert out.shape == (B, n_patches, hidden)
    max_err = float(jnp.max(jnp.abs(out - ref)))
    assert max_err < 2e-3, f"mismatch vs reference: {max_err}"

    print("KERNEL_OK")
</pallas_src>

<mosaic_0001>
module attributes {stable_mosaic.version = 11 : i64} {
  func.func @_patch_embed_kernel(%arg0: i32, %arg1: i32, %arg2: i32, %arg3: memref<64x256xbf16, #tpu.memory_space<vmem>>, %arg4: memref<256x128xbf16, #tpu.memory_space<vmem>>, %arg5: memref<64x128xf32, #tpu.memory_space<vmem>>, %arg6: memref<64x128xf32, #tpu.memory_space<vmem>>) attributes {dimension_semantics = [#tpu.dimension_semantics<parallel>, #tpu.dimension_semantics<parallel>, #tpu.dimension_semantics<arbitrary>], iteration_bounds = array<i64: 2, 1, 1>, scalar_prefetch = 0 : i64, scratch_operands = 0 : i64, tpu.core_type = #tpu.core_type<tc>, window_params = [{transform_indices = @transform_0, window_bounds = array<i64: 64, 256>}, {transform_indices = @transform_1, window_bounds = array<i64: 256, 128>}, {transform_indices = @transform_2, window_bounds = array<i64: 64, 128>}, {transform_indices = @transform_3, window_bounds = array<i64: 64, 128>}]} {
    %c0 = arith.constant 0 : index
    %c0_0 = arith.constant 0 : index
    %0 = vector.load %arg3[%c0, %c0_0] : memref<64x256xbf16, #tpu.memory_space<vmem>>, vector<64x256xbf16>
    %c0_1 = arith.constant 0 : index
    %c0_2 = arith.constant 0 : index
    %1 = vector.load %arg4[%c0_1, %c0_2] : memref<256x128xbf16, #tpu.memory_space<vmem>>, vector<256x128xbf16>
    %cst = arith.constant dense<0.000000e+00> : vector<64x128xf32>
    %2 = tpu.matmul %0, %1, %cst {dimension_numbers = #tpu.dot_dimension_numbers<[1], [0], [0], [1], [0, 0, 1, 1], [], []>} : vector<64x256xbf16>, vector<256x128xbf16>, vector<64x128xf32> -> vector<64x128xf32>
    %c0_3 = arith.constant 0 : index
    %c0_4 = arith.constant 0 : index
    %3 = vector.load %arg5[%c0_3, %c0_4] : memref<64x128xf32, #tpu.memory_space<vmem>>, vector<64x128xf32>
    %4 = arith.addf %2, %3 : vector<64x128xf32>
    %c0_5 = arith.constant 0 : index
    %c0_6 = arith.constant 0 : index
    %5 = vector.load %arg6[%c0_5, %c0_6] : memref<64x128xf32, #tpu.memory_space<vmem>>, vector<64x128xf32>
    tpu.vector_store %arg6[%c0_5, %c0_6], %4 {strides = array<i32>} : memref<64x128xf32, #tpu.memory_space<vmem>>, vector<64x128xf32>,
    return
  }
  func.func @transform_0(%arg0: i32, %arg1: i32, %arg2: i32) -> (i32, i32) {
    %c0_i32 = arith.constant 0 : i32
    return %arg0, %arg2 : i32, i32
  }
  func.func @transform_1(%arg0: i32, %arg1: i32, %arg2: i32) -> (i32, i32) {
    %c0_i32 = arith.constant 0 : i32
    return %arg2, %arg1 : i32, i32
  }
  func.func @transform_2(%arg0: i32, %arg1: i32, %arg2: i32) -> (i32, i32) {
    %c1_i32 = arith.constant 1 : i32
    %c0_i32 = arith.constant 0 : i32
    %0 = arith.cmpi eq, %c1_i32, %c0_i32 : i32
    %c1_i32_0 = arith.constant 1 : i32
    %1 = arith.select %0, %c1_i32_0, %c1_i32 : i32
    %2 = arith.remsi %arg0, %1 : i32
    %c0_i32_1 = arith.constant 0 : i32
    %3 = arith.cmpi ne, %2, %c0_i32_1 : i32
    %c0_i32_2 = arith.constant 0 : i32
    %4 = arith.cmpi slt, %2, %c0_i32_2 : i32
    %c0_i32_3 = arith.constant 0 : i32
    %5 = arith.cmpi slt, %1, %c0_i32_3 : i32
    %6 = arith.xori %4, %5 : i1
    %7 = arith.andi %6, %3 : i1
    %8 = arith.addi %2, %1 : i32
    %9 = arith.select %7, %8, %2 : i32
    %c0_i32_4 = arith.constant 0 : i32
    return %9, %arg1 : i32, i32
  }
  func.func @transform_3(%arg0: i32, %arg1: i32, %arg2: i32) -> (i32, i32) {
    %c0_i32 = arith.constant 0 : i32
    return %arg0, %arg1 : i32, i32
  }
}

</mosaic_0001>

<bundles_post_ra>
// kernel: patch_embedding_block.1
= control target key start
LH: loop header
LB: loop body
LE: loop exit
PB: predicated region body
PF: predicated region fallthrough
CT: control target
= control target key end

     0   :  { %s836_s12 = smov 0   ;;  %s838_s13 = smov 0   ;;  %s968_s0 = inlined_call_operand.vmem [shape: bf16[128,256], index: 0, kind: input, shape index: {}]   ;;  %s969_s1 = inlined_call_operand.vmem [shape: bf16[256,128], index: 1, kind: input, shape index: {}]   ;;  %s970_s2 = inlined_call_operand.vmem [shape: f32[64,128], index: 2, kind: input, shape index: {}]   ;;  %s971_s3 = inlined_call_operand.vmem [shape: f32[128,128], index: 3, kind: output, shape index: {}]  }
   0x1   :  { %s840_s14 = smov 0  }
   0x2 LB: > { %s32_s15 = sadd.s32 1, %s810_s13  ;;  %p651_p0 = scmp.ge.s32.totalorder %s814_s14, 1  ;;  %s814_s14 = sphi %s840_s14, %s13_s14   ;;  %s810_s13 = sphi %s838_s13, %s973_s13   ;;  %s806_s12 = sphi %s836_s12, %s972_s12  }
   0x3   : > { %p34_p1 = scmp.ge.s32.totalorder %s32_s15, 2  ;;  %p192_p2 = scmp.lt.s32.totalorder %s814_s14, 3 }
   0x5   : > { %s975_s15 = smov (%p34_p1, %s32_s15), 0  ;;  %p193_p3 = pnand %p651_p0, %p192_p2 }
   0x6   : > { %s652_s18 = sshll.u32 (!%p193_p3), %s806_s12, 3 }
   0x7   : > { %196 = sbr.rel (%p193_p3) target bundleno = 257 (0x101), region = 32  ;;  %p238_p4 = scmp.lt.s32.totalorder (!%p193_p3), %s652_s18, 15 }
   0xc   : > { %v764_v0 = vld [vmem:[%s969_s1 + $0x78] sm:$0xff]   ;;  %v766_v2 = vld [vmem:[%s969_s1 + $0x70] sm:$0xff]   ;;  %v768_v4 = vld [vmem:[%s969_s1 + $0x68] sm:$0xff]   ;;  %s977_s18 = smov (!%p238_p4, %s652_s18), 15 }
   0xd   : > { %v765_v1 = vld [vmem:[%s969_s1 + $0x38] sm:$0xff]   ;;  %684 = vmatprep.subr.bf16.mxu0 %v764_v0  ;;  %724 = vmatprep.subr.bf16.mxu1 %v764_v0  ;;  %v767_v3 = vld [vmem:[%s969_s1 + $0x30] sm:$0xff]   ;;  %v769_v5 = vld [vmem:[%s969_s1 + $0x28] sm:$0xff]   ;;  %s683_s6 = sshll.u32 %s977_s18, 3 }
   0xe   : > { %685 = vmatpush3.bf16.msra.mxu0 %v765_v1  ;;  %732 = vmatpush3.bf16.msra.mxu1 %v765_v1  ;;  %v770_v6 = vld [vmem:[%s969_s1 + $0x60] sm:$0xff]   ;;  %v772_v8 = vld [vmem:[%s969_s1 + $0x58] sm:$0xff]   ;;  %s889_s11 = scalar_lea.vmem %s968_s0, %s683_s6  ;;  %v774_v10 = vld [vmem:[%s969_s1 + $0x50] sm:$0xff]   ;;  %s931_s10 = scalar_lea.vmem %s971_s3, %s683_s6 }
   0xf   : > { %686 = vmatprep.subr.bf16.mxu0 %v766_v2  ;;  %725 = vmatprep.subr.bf16.mxu1 %v766_v2  ;;  %v771_v7 = vld [vmem:[%s969_s1 + $0x20] sm:$0xff]   ;;  %v773_v9 = vld [vmem:[%s969_s1 + $0x18] sm:$0xff]   ;;  %v775_v13 = vld [vmem:[%s969_s1 + $0x10] sm:$0xff]  }
  0x10   : > { %v782_v11 = vld [vmem:[%s889_s11 + $0x4] ss:$8 sps:$4 sm:$0xff]   ;;  %v780_v18 = vld [vmem:[%s889_s11] ss:$8 sps:$4 sm:$0xff]   ;;  %v786_v20 = vld [vmem:[%s889_s11 + $0x14] ss:$8 sps:$4 sm:$0xff]  }
  0x11   : > { %v785_v12 = vld [vmem:[%s889_s11 + $0x24] ss:$8 sps:$4 sm:$0xff]   ;;  %487 = vmatprep.mubr.bf16.mxu0 %v782_v11  ;;  %v783_v19 = vld [vmem:[%s889_s11 + $0x20] ss:$8 sps:$4 sm:$0xff]   ;;  %v788_v21 = vld [vmem:[%s889_s11 + $0x34] ss:$8 sps:$4 sm:$0xff]  }
  0x12   : > { %687 = vmatpush3.bf16.msra.mxu0 %v767_v3  ;;  %733 = vmatpush3.bf16.msra.mxu1 %v767_v3  ;;  %v776_v14 = vld [vmem:[%s969_s1 + $0x48] sm:$0xff]   ;;  %v778_v16 = vld [vmem:[%s969_s1 + $0x40] sm:$0xff]   ;;  %v790_v22 = vld [vmem:[%s889_s11 + $0x10] ss:$8 sps:$4 sm:$0xff]  }
  0x13   : > { %688 = vmatprep.subr.bf16.mxu0 %v768_v4  ;;  %726 = vmatprep.subr.bf16.mxu1 %v768_v4  ;;  %v777_v15 = vld [vmem:[%s969_s1 + $0x8] sm:$0xff]   ;;  %v779_v17 = vld [vmem:[%s969_s1] sm:$0xff]   ;;  %v791_v23 = vld [vmem:[%s889_s11 + $0x30] ss:$8 sps:$4 sm:$0xff]  }
  0x14   : > { %503 = vmatprep.mubr.bf16.mxu1 %v785_v12  ;;  %v311_v26 = vld [vmem:[%s970_s2] sm:$0xff]  ;;  %v312_v36 = vld [vmem:[%s970_s2 + $0x8] sm:$0xff]  ;;  %v313_v46 = vld [vmem:[%s970_s2 + $0x10] sm:$0xff] }
  0x15   : > { %v315_v28 = vld [vmem:[%s970_s2 + $0x20] sm:$0xff]  ;;  %v316_v38 = vld [vmem:[%s970_s2 + $0x28] sm:$0xff]  ;;  %v317_v48 = vld [vmem:[%s970_s2 + $0x30] sm:$0xff] }
  0x16   : > { %689 = vmatpush3.bf16.msra.mxu0 %v769_v5  ;;  %734 = vmatpush3.bf16.msra.mxu1 %v769_v5  ;;  %v314_v56 = vld [vmem:[%s970_s2 + $0x18] sm:$0xff] }
  0x17   : > { %690 = vmatprep.subr.bf16.mxu0 %v770_v6  ;;  %727 = vmatprep.subr.bf16.mxu1 %v770_v6  ;;  %v318_v58 = vld [vmem:[%s970_s2 + $0x38] sm:$0xff] }
  0x1a   : > { %691 = vmatpush3.bf16.msra.mxu0 %v771_v7  ;;  %735 = vmatpush3.bf16.msra.mxu1 %v771_v7 }
  0x1b   : > { %692 = vmatprep.subr.bf16.mxu0 %v772_v8  ;;  %728 = vmatprep.subr.bf16.mxu1 %v772_v8 }
  0x1e   : > { %693 = vmatpush3.bf16.msra.mxu0 %v773_v9  ;;  %736 = vmatpush3.bf16.msra.mxu1 %v773_v9 }
  0x1f   : > { %694 = vmatprep.subr.bf16.mxu0 %v774_v10  ;;  %729 = vmatprep.subr.bf16.mxu1 %v774_v10 }
  0x22   : > { %695 = vmatpush3.bf16.msra.mxu0 %v775_v13  ;;  %737 = vmatpush3.bf16.msra.mxu1 %v775_v13 }
  0x23   : > { %696 = vmatprep.subr.bf16.mxu0 %v776_v14  ;;  %730 = vmatprep.subr.bf16.mxu1 %v776_v14 }
  0x26   : > { %697 = vmatpush3.bf16.msra.mxu0 %v777_v15  ;;  %738 = vmatpush3.bf16.msra.mxu1 %v777_v15 }
  0x27   : > { %698 = vmatprep.subr.bf16.mxu0 %v778_v16  ;;  %731 = vmatprep.subr.bf16.mxu1 %v778_v16 }
  0x2a   : > { %699 = vmatpush3.bf16.msra.mxu0 %v779_v17  ;;  %739 = vmatpush3.bf16.msra.mxu1 %v779_v17 }
  0x2d   : > { %488 = vmatmul.mubr.bf16.vlgmr.msra.gmra.mxu0 %v780_v18  ;;  %504 = vmatmul.mubr.bf16.vlgmr.msra.gmra.mxu1 %v783_v19 }
  0x2e   : > { %495 = vmatprep.mubr.bf16.mxu0 %v786_v20  ;;  %511 = vmatprep.mubr.bf16.mxu1 %v788_v21 }
  0x35   : > { %496 = vmatmul.mubr.bf16.gmra.mxu0 %v790_v22  ;;  %512 = vmatmul.mubr.bf16.gmra.mxu1 %v791_v23 }
  0xed   : > { %v700_v24 = vpop.f32.mrf.mxu0  ;;  %v712_v25 = vpop.f32.mrf.mxu1 }
  0xef   : > { %v701_v27 = vpop.f32.mrf.mxu0  ;;  %v713_v29 = vpop.f32.mrf.mxu1 }
  0xf0   : > { %v702_v30 = vadd.f32 %v701_v27, %v700_v24  ;;  %v714_v31 = vadd.f32 %v713_v29, %v712_v25 }
  0xf1   : > { %v703_v32 = vpop.f32.mrf.mxu0  ;;  %v715_v33 = vpop.f32.mrf.mxu1 }
  0xf2   : > { %v490_v34 = vadd.f32 %v702_v30, %v311_v26  ;;  %v506_v35 = vadd.f32 %v714_v31, %v315_v28 }
  0xf3   : > { %v704_v37 = vpop.f32.mrf.mxu0  ;;  %v716_v39 = vpop.f32.mrf.mxu1 }
  0xf4   : > { %520 = vst [vmem:[%s931_s10] sm:$0xff] %v490_v34  ;;  %524 = vst [vmem:[%s931_s10 + $0x20] sm:$0xff] %v506_v35  ;;  %v705_v40 = vadd.f32 %v704_v37, %v703_v32  ;;  %v717_v41 = vadd.f32 %v716_v39, %v715_v33 }
  0xf5   : > { %v706_v42 = vpop.f32.mrf.mxu0  ;;  %v718_v43 = vpop.f32.mrf.mxu1 }
  0xf6   : > { %v493_v44 = vadd.f32 %v705_v40, %v312_v36  ;;  %v509_v45 = vadd.f32 %v717_v41, %v316_v38 }
  0xf7   : > { %v707_v47 = vpop.f32.mrf.mxu0  ;;  %v719_v49 = vpop.f32.mrf.mxu1 }
  0xf8   : > { %521 = vst [vmem:[%s931_s10 + $0x8] sm:$0xff] %v493_v44  ;;  %525 = vst [vmem:[%s931_s10 + $0x28] sm:$0xff] %v509_v45  ;;  %v708_v50 = vadd.f32 %v707_v47, %v706_v42  ;;  %v720_v51 = vadd.f32 %v719_v49, %v718_v43 }
  0xf9   : > { %v709_v52 = vpop.f32.mrf.mxu0  ;;  %v721_v53 = vpop.f32.mrf.mxu1 }
  0xfa   : > { %v498_v54 = vadd.f32 %v708_v50, %v313_v46  ;;  %v514_v55 = vadd.f32 %v720_v51, %v317_v48 }
  0xfb   : > { %v710_v57 = vpop.f32.mrf.mxu0  ;;  %v722_v59 = vpop.f32.mrf.mxu1 }
  0xfc   : > { %522 = vst [vmem:[%s931_s10 + $0x10] sm:$0xff] %v498_v54  ;;  %526 = vst [vmem:[%s931_s10 + $0x30] sm:$0xff] %v514_v55  ;;  %v711_v60 = vadd.f32 %v710_v57, %v709_v52  ;;  %v723_v61 = vadd.f32 %v722_v59, %v721_v53 }
  0xfe   : > { %v501_v62 = vadd.f32 %v711_v60, %v314_v56  ;;  %v517_v63 = vadd.f32 %v723_v61, %v318_v58 }
 0x100   : > { %523 = vst [vmem:[%s931_s10 + $0x18] sm:$0xff] %v501_v62  ;;  %527 = vst [vmem:[%s931_s10 + $0x38] sm:$0xff] %v517_v63 }
 0x101 PF: > { %s13_s14 = sadd.s32 1, %s814_s14   ;;  %s972_s12 = smov %s810_s13 }
 0x102   : > { %p10_p5 = scmp.ge.s32.totalorder %s13_s14, 4   ;;  %s973_s13 = smov %s975_s15 }
 0x104   :  { %12 = sbr.rel (!%p10_p5) target bundleno = 2 (0x2), region = 68 }

</bundles_post_ra>
